<compile_context>
chip_gen: v6e
topology: v6e:2x2x1
jax: 0.10.0
libtpu: 0.0.40
codegen_flags: <defaults>
</compile_context>

<pallas_src>
import jax
import jax.numpy as jnp
from jax.experimental import pallas as pl
from jax.experimental.pallas import tpu as pltpu


def _round_up(x, m):
    return (x + m - 1) // m * m


def _cdiv(a, b):
    return (a + b - 1) // b


def _vmem_capacity_bytes():
    """Physical per-core VMEM: 128 MiB on v5e/v6e, 64 MiB per TC on v7x."""
    try:
        cap = int(pltpu.get_tpu_info().vmem_capacity_bytes)
        if cap > 0:
            return cap
    except Exception:
        pass
    try:
        kind = jax.devices()[0].device_kind.lower()
        if "v7" in kind or "7x" in kind:
            return 64 * 1024 * 1024
    except Exception:
        pass
    return 128 * 1024 * 1024


def _ffn_kernel_single(x_ref, w1_ref, b1_ref, w2_ref, b2_ref, o_ref):
    # Whole (small) weight set resident in VMEM; no reduction axis.
    h = jnp.dot(x_ref[...], w1_ref[...], preferred_element_type=jnp.float32)
    h = h + b1_ref[...]
    # TODO(synk): PyTorch F.gelu default is the erf-exact GELU; tanh approx differs by ~1e-3.
    h = jax.nn.gelu(h, approximate=True)
    y = jnp.dot(h.astype(w2_ref.dtype), w2_ref[...],
                preferred_element_type=jnp.float32)
    o_ref[...] = (y + b2_ref[...]).astype(o_ref.dtype)


def _ffn_kernel_tiled(x_ref, w1_ref, b1_ref, w2_ref, b2_ref, o_ref, acc_ref):
    k = pl.program_id(1)

    # fc1 chunk: (tm, Dp) @ (Dp, tk) -> (tm, tk); bf16 operands, f32 accumulate.
    h = jnp.dot(x_ref[...], w1_ref[...], preferred_element_type=jnp.float32)
    h = h + b1_ref[...]
    # TODO(synk): PyTorch F.gelu default is the erf-exact GELU; tanh approx differs by ~1e-3.
    h = jax.nn.gelu(h, approximate=True)

    # fc2 partial sum over this H chunk.
    partial = jnp.dot(h.astype(w2_ref.dtype), w2_ref[...],
                      preferred_element_type=jnp.float32)

    @pl.when(k == 0)
    def _first():
        acc_ref[...] = partial            # no separate zeroing pass

    @pl.when(k > 0)
    def _accum():
        acc_ref[...] += partial

    @pl.when(k == pl.num_programs(1) - 1)
    def _finalize():
        o_ref[...] = (acc_ref[...] + b2_ref[...]).astype(o_ref.dtype)


def feed_forward(x, w1, b1, w2, b2, *, tm=None, tk=None,
                 compute_dtype=jnp.bfloat16, out_dtype=None):
    """FeedForward: fc2(gelu(fc1(x))).  x: [..., D] -> [..., D]."""
    orig_shape = x.shape
    D = orig_shape[-1]
    H = w1.shape[1]
    M = 1
    for s in orig_shape[:-1]:
        M *= s

    out_dtype = x.dtype if out_dtype is None else jnp.dtype(out_dtype)
    cdt = jnp.dtype(compute_dtype if compute_dtype is not None else x.dtype)
    csz = cdt.itemsize
    osz = jnp.dtype(out_dtype).itemsize

    vmem_cap = _vmem_capacity_bytes()
    vmem_budget = (vmem_cap * 3) // 4        # headroom for Mosaic internal scratch

    # ---- tile selection ------------------------------------------------------
    if tm is None:
        tm = 1024 if vmem_cap >= 100 * 1024 * 1024 else 512
    if tk is None:
        tk = 256

    Dp = _round_up(D, 128)
    Hp = _round_up(H, 128)

    # Small models: keep W1/W2 fully resident and drop the reduction axis.
    if 2 * Dp * Hp * csz <= 4 * 1024 * 1024:
        tk = Hp
    tk = _round_up(min(tk, Hp), 128)
    Hp = _round_up(Hp, tk)
    nk = Hp // tk

    # Row tile: multiple of 16 (bf16 packs 2 rows / sublane); keep >= 2 parallel
    # blocks when M is big enough so v7x's second TensorCore has work.
    tm = max(16, _round_up(min(tm, _round_up(M, 16)), 16))
    if M >= 32 and _cdiv(M, tm) < 2:
        tm = max(16, _round_up(_cdiv(M, 2), 16))

    def _vmem_est(tm_):
        est = 2 * tm_ * Dp * csz                 # x tile (double-buffered)
        est += 2 * (Dp * tk + tk * Dp) * csz     # W1 / W2 chunks
        est += 2 * (tk + Dp) * 4                 # biases (f32)
        est += 2 * tm_ * Dp * osz                # output tile
        est += tm_ * tk * (4 + csz)              # fc1/GELU intermediate + recast
        if nk > 1:
            est += tm_ * Dp * 4                  # f32 accumulator scratch
        return est

    while _vmem_est(tm) > vmem_budget and tm > 16:
        tm = max(16, _round_up(tm // 2, 16))

    Mp = _round_up(M, tm)
    ni = Mp // tm

    vmem_limit = int(min(max(_vmem_est(tm) * 5 // 4 + (2 << 20),
                             32 * 1024 * 1024),
                         vmem_budget))

    # ---- pad & cast operands (skipped when already aligned / right dtype) ----
    # TODO(synk): for repeated calls, pre-pad/cast the weights once outside this wrapper.
    x_flat = x.reshape(M, D)
    if M == Mp and D == Dp and x_flat.dtype == cdt:
        x2 = x_flat
    else:
        x2 = jnp.zeros((Mp, Dp), cdt).at[:M, :D].set(x_flat.astype(cdt))

    if w1.shape == (Dp, Hp) and w1.dtype == cdt:
        w1p = w1
    else:
        w1p = jnp.zeros((Dp, Hp), cdt).at[:D, :H].set(w1.astype(cdt))

    if w2.shape == (Hp, Dp) and w2.dtype == cdt:
        w2p = w2
    else:
        w2p = jnp.zeros((Hp, Dp), cdt).at[:H, :D].set(w2.astype(cdt))

    if b1.shape == (Hp,) and b1.dtype == jnp.float32:
        b1p = b1.reshape(1, Hp)
    else:
        b1p = jnp.zeros((1, Hp), jnp.float32).at[0, :H].set(b1.astype(jnp.float32))

    if b2.shape == (Dp,) and b2.dtype == jnp.float32:
        b2p = b2.reshape(1, Dp)
    else:
        b2p = jnp.zeros((1, Dp), jnp.float32).at[0, :D].set(b2.astype(jnp.float32))

    # ---- cost estimate (weights re-streamed once per row tile when tiled) ----
    weight_passes = ni if nk > 1 else 1
    cost = pl.CostEstimate(
        flops=4 * Mp * Dp * Hp,
        transcendentals=Mp * Hp,
        bytes_accessed=int(Mp * Dp * csz + Mp * Dp * osz
                           + weight_passes * 2 * Dp * Hp * csz
                           + Hp * 4 + Dp * 4),
    )

    if nk == 1:
        kernel = _ffn_kernel_single
        dim_sem = ("parallel",)
        grid_spec = pltpu.PrefetchScalarGridSpec(
            num_scalar_prefetch=0,
            grid=(ni,),
            in_specs=[
                pl.BlockSpec((tm, Dp), lambda i: (i, 0)),   # x rows
                pl.BlockSpec((Dp, Hp), lambda i: (0, 0)),   # W1 (resident)
                pl.BlockSpec((1, Hp), lambda i: (0, 0)),    # b1
                pl.BlockSpec((Hp, Dp), lambda i: (0, 0)),   # W2 (resident)
                pl.BlockSpec((1, Dp), lambda i: (0, 0)),    # b2
            ],
            out_specs=pl.BlockSpec((tm, Dp), lambda i: (i, 0)),
            scratch_shapes=[],
        )
    else:
        kernel = _ffn_kernel_tiled
        dim_sem = ("parallel", "arbitrary")
        grid_spec = pltpu.PrefetchScalarGridSpec(
            num_scalar_prefetch=0,
            grid=(ni, nk),
            in_specs=[
                pl.BlockSpec((tm, Dp), lambda i, k: (i, 0)),   # x rows (resident over k)
                pl.BlockSpec((Dp, tk), lambda i, k: (0, k)),   # W1 column chunk
                pl.BlockSpec((1, tk), lambda i, k: (0, k)),    # b1 chunk
                pl.BlockSpec((tk, Dp), lambda i, k: (k, 0)),   # W2 row chunk
                pl.BlockSpec((1, Dp), lambda i, k: (0, 0)),    # b2
            ],
            out_specs=pl.BlockSpec((tm, Dp), lambda i, k: (i, 0)),
            scratch_shapes=[pltpu.VMEM((tm, Dp), jnp.float32)],
        )

    out = pl.pallas_call(
        kernel,
        out_shape=jax.ShapeDtypeStruct((Mp, Dp), out_dtype),
        grid_spec=grid_spec,
        compiler_params=pltpu.CompilerParams(
            dimension_semantics=dim_sem,
            vmem_limit_bytes=vmem_limit,
        ),
        cost_estimate=cost,
    )(x2, w1p, b1p, w2p, b2p)

    return out[:M, :D].reshape(orig_shape)


def reference(x, w1, b1, w2, b2):
    x32 = x.astype(jnp.float32)
    h = jax.nn.gelu(x32 @ w1 + b1, approximate=True)
    y = h @ w2 + b2
    return y.astype(x.dtype)


if __name__ == "__main__":
    # Small shapes consistent with the module: batch=2, seq=8, dim=32, hidden_dim=64
    B, S, D, H = 2, 8, 32, 64

    key = jax.random.PRNGKey(0)
    kx, k1, k2, k3, k4 = jax.random.split(key, 5)

    x = jax.random.normal(kx, (B, S, D), dtype=jnp.float32)
    w1 = jax.random.normal(k1, (D, H), dtype=jnp.float32) / jnp.sqrt(D)
    b1 = jax.random.normal(k2, (H,), dtype=jnp.float32) * 0.01
    w2 = jax.random.normal(k3, (H, D), dtype=jnp.float32) / jnp.sqrt(H)
    b2 = jax.random.normal(k4, (D,), dtype=jnp.float32) * 0.01

    out = feed_forward(x, w1, b1, w2, b2)
    out = jax.block_until_ready(out)

    ref = reference(x, w1, b1, w2, b2)
    assert out.shape == x.shape and out.dtype == x.dtype
    max_err = float(jnp.max(jnp.abs(out - ref)))
    # bf16 matmul operands with f32 accumulation -> small relative error vs f32 ref
    assert jnp.allclose(out, ref, atol=2e-2, rtol=2e-2), f"mismatch vs reference (max err {max_err})"

    print("KERNEL_OK")
</pallas_src>

<mosaic_0001>
module attributes {stable_mosaic.version = 11 : i64} {
  func.func @_ffn_kernel_single(%arg0: i32, %arg1: memref<16x128xbf16, #tpu.memory_space<vmem>>, %arg2: memref<128x128xbf16, #tpu.memory_space<vmem>>, %arg3: memref<1x128xf32, #tpu.memory_space<vmem>>, %arg4: memref<128x128xbf16, #tpu.memory_space<vmem>>, %arg5: memref<1x128xf32, #tpu.memory_space<vmem>>, %arg6: memref<16x128xf32, #tpu.memory_space<vmem>>) attributes {dimension_semantics = [#tpu.dimension_semantics<parallel>], iteration_bounds = array<i64: 1>, scalar_prefetch = 0 : i64, scratch_operands = 0 : i64, tpu.core_type = #tpu.core_type<tc>, window_params = [{transform_indices = @transform_0, window_bounds = array<i64: 16, 128>}, {pipeline_mode = #tpu.pipeline_mode<synchronous>, transform_indices = @transform_1, window_bounds = array<i64: 128, 128>}, {pipeline_mode = #tpu.pipeline_mode<synchronous>, transform_indices = @transform_2, window_bounds = array<i64: 1, 128>}, {pipeline_mode = #tpu.pipeline_mode<synchronous>, transform_indices = @transform_3, window_bounds = array<i64: 128, 128>}, {pipeline_mode = #tpu.pipeline_mode<synchronous>, transform_indices = @transform_4, window_bounds = array<i64: 1, 128>}, {transform_indices = @transform_5, window_bounds = array<i64: 16, 128>}]} {
    %c0 = arith.constant 0 : index
    %c0_0 = arith.constant 0 : index
    %0 = vector.load %arg1[%c0, %c0_0] : memref<16x128xbf16, #tpu.memory_space<vmem>>, vector<16x128xbf16>
    %c0_1 = arith.constant 0 : index
    %c0_2 = arith.constant 0 : index
    %1 = vector.load %arg2[%c0_1, %c0_2] : memref<128x128xbf16, #tpu.memory_space<vmem>>, vector<128x128xbf16>
    %cst = arith.constant dense<0.000000e+00> : vector<16x128xf32>
    %2 = tpu.matmul %0, %1, %cst {dimension_numbers = #tpu.dot_dimension_numbers<[1], [0], [0], [1], [0, 0, 1, 1], [], []>} : vector<16x128xbf16>, vector<128x128xbf16>, vector<16x128xf32> -> vector<16x128xf32>
    %c0_3 = arith.constant 0 : index
    %c0_4 = arith.constant 0 : index
    %3 = vector.load %arg3[%c0_3, %c0_4] : memref<1x128xf32, #tpu.memory_space<vmem>>, vector<1x128xf32>
    %4 = vector.broadcast %3 : vector<1x128xf32> to vector<16x128xf32>
    %5 = arith.addf %2, %4 : vector<16x128xf32>
    %6 = arith.mulf %5, %5 : vector<16x128xf32>
    %7 = arith.mulf %5, %6 : vector<16x128xf32>
    %cst_5 = arith.constant 4.471500e-02 : f32
    %8 = vector.broadcast %cst_5 : f32 to vector<16x128xf32>
    %9 = arith.mulf %8, %7 : vector<16x128xf32>
    %10 = arith.addf %5, %9 : vector<16x128xf32>
    %cst_6 = arith.constant 0.797884583 : f32
    %11 = vector.broadcast %cst_6 : f32 to vector<16x128xf32>
    %12 = arith.mulf %11, %10 : vector<16x128xf32>
    %13 = math.tanh %12 : vector<16x128xf32>
    %cst_7 = arith.constant 1.000000e+00 : f32
    %14 = vector.broadcast %cst_7 : f32 to vector<16x128xf32>
    %15 = arith.addf %14, %13 : vector<16x128xf32>
    %cst_8 = arith.constant 5.000000e-01 : f32
    %16 = vector.broadcast %cst_8 : f32 to vector<16x128xf32>
    %17 = arith.mulf %16, %15 : vector<16x128xf32>
    %18 = arith.mulf %5, %17 : vector<16x128xf32>
    %19 = arith.truncf %18 : vector<16x128xf32> to vector<16x128xbf16>
    %c0_9 = arith.constant 0 : index
    %c0_10 = arith.constant 0 : index
    %20 = vector.load %arg4[%c0_9, %c0_10] : memref<128x128xbf16, #tpu.memory_space<vmem>>, vector<128x128xbf16>
    %cst_11 = arith.constant dense<0.000000e+00> : vector<16x128xf32>
    %21 = tpu.matmul %19, %20, %cst_11 {dimension_numbers = #tpu.dot_dimension_numbers<[1], [0], [0], [1], [0, 0, 1, 1], [], []>} : vector<16x128xbf16>, vector<128x128xbf16>, vector<16x128xf32> -> vector<16x128xf32>
    %c0_12 = arith.constant 0 : index
    %c0_13 = arith.constant 0 : index
    %22 = vector.load %arg5[%c0_12, %c0_13] : memref<1x128xf32, #tpu.memory_space<vmem>>, vector<1x128xf32>
    %23 = vector.broadcast %22 : vector<1x128xf32> to vector<16x128xf32>
    %24 = arith.addf %21, %23 : vector<16x128xf32>
    %c0_14 = arith.constant 0 : index
    %c0_15 = arith.constant 0 : index
    %25 = vector.load %arg6[%c0_14, %c0_15] : memref<16x128xf32, #tpu.memory_space<vmem>>, vector<16x128xf32>
    tpu.vector_store %arg6[%c0_14, %c0_15], %24 {strides = array<i32>} : memref<16x128xf32, #tpu.memory_space<vmem>>, vector<16x128xf32>,
    return
  }
  func.func @transform_0(%arg0: i32) -> (i32, i32) {
    %c0_i32 = arith.constant 0 : i32
    %c0_i32_0 = arith.constant 0 : i32
    return %arg0, %c0_i32 : i32, i32
  }
  func.func @transform_1(%arg0: i32) -> (i32, i32) {
    %c0_i32 = arith.constant 0 : i32
    %c0_i32_0 = arith.constant 0 : i32
    %c0_i32_1 = arith.constant 0 : i32
    return %c0_i32, %c0_i32_0 : i32, i32
  }
  func.func @transform_2(%arg0: i32) -> (i32, i32) {
    %c0_i32 = arith.constant 0 : i32
    %c0_i32_0 = arith.constant 0 : i32
    %c0_i32_1 = arith.constant 0 : i32
    return %c0_i32, %c0_i32_0 : i32, i32
  }
  func.func @transform_3(%arg0: i32) -> (i32, i32) {
    %c0_i32 = arith.constant 0 : i32
    %c0_i32_0 = arith.constant 0 : i32
    %c0_i32_1 = arith.constant 0 : i32
    return %c0_i32, %c0_i32_0 : i32, i32
  }
  func.func @transform_4(%arg0: i32) -> (i32, i32) {
    %c0_i32 = arith.constant 0 : i32
    %c0_i32_0 = arith.constant 0 : i32
    %c0_i32_1 = arith.constant 0 : i32
    return %c0_i32, %c0_i32_0 : i32, i32
  }
  func.func @transform_5(%arg0: i32) -> (i32, i32) {
    %c0_i32 = arith.constant 0 : i32
    %c0_i32_0 = arith.constant 0 : i32
    return %arg0, %c0_i32 : i32, i32
  }
}

</mosaic_0001>

<bundles_post_ra>
// kernel: tpu_custom_call.1
= control target key start
LH: loop header
LB: loop body
LE: loop exit
PB: predicated region body
PF: predicated region fallthrough
CT: control target
= control target key end

     0   :  { %10 = vsyncpa [#allocation3], 0  ;;  %s586_s0 = inlined_call_operand.hbm [shape: bf16[16,128], index: 0, kind: input, shape index: {}]   ;;  %s587_s1 = inlined_call_operand.hbm [shape: bf16[128,128], index: 1, kind: input, shape index: {}]   ;;  %s588_s2 = inlined_call_operand.vmem [shape: f32[1,128], index: 2, kind: input, shape index: {}]   ;;  %s589_s3 = inlined_call_operand.hbm [shape: bf16[128,128], index: 3, kind: input, shape index: {}]   ;;  %s590_s4 = inlined_call_operand.vmem [shape: f32[1,128], index: 4, kind: input, shape index: {}]   ;;  %s591_s5 = inlined_call_operand.hbm [shape: f32[16,128], index: 5, kind: output, shape index: {}]  }
   0x1   :  { %11 = vsyncpa [#allocation6], 0 }
   0x2   :  { %12 = vsyncpa [#allocation4], 0  ;;  %s528_s18 = smov [#allocation5]   ;;  %s529_s20 = smov [#allocation2]  }
   0x3   :  { %s30_s19 = sshll.u32 %s528_s18, 4  ;;  %s18_s21 = sshll.u32 %s529_s20, 4  ;;  %s31_s19 = int_to_ptr.vmem [resolvable:$true] %s30_s19  ;;  %s19_s21 = int_to_ptr.vmem [resolvable:$true] %s18_s21 }
   0x4   :  { %s450_s22 = scalar_lea.vmem %s31_s19, 1024  ;;  %p455_p1 = scmp.lt.s32.totalorder %s31_s19, %s31_s19 }
   0x5   :  { %p451_p0 = scmp.ne.s32.totalorder %s31_s19, %s450_s22  ;;  %p456_p2 = scmp.lt.s32.totalorder %s450_s22, %s450_s22 }
   0x7   :  { %p457_p3 = por %p456_p2, %p455_p1 }
   0x9   :  { %p458_p4 = pnand %p457_p3, %p451_p0 }
   0xb   :  { %461 = shalt.err (!%p458_p4)
}
   0xc   :  { %s530_s23 = smov 64   ;;  %s531_s24 = smov 4  }
   0xd   :  { %36 = dma.hbm_to_vmem [thread:$0]  %s587_s1, 1024, %s31_s19, [#allocation6], %s530_s23, %s530_s23, %s531_s24  }
   0xe   :  { %s470_s27 = scalar_lea.vmem %s19_s21, 128  ;;  %p475_p6 = scmp.lt.s32.totalorder %s19_s21, %s19_s21 }
   0xf   :  { %p471_p5 = scmp.ne.s32.totalorder %s19_s21, %s470_s27  ;;  %p476_p7 = scmp.lt.s32.totalorder %s470_s27, %s470_s27 }
  0x11   :  { %p477_p8 = por %p476_p7, %p475_p6 }
  0x13   :  { %p478_p9 = pnand %p477_p8, %p471_p5 }
  0x15   :  { %481 = shalt.err (!%p478_p9)
}
  0x16   :  { %24 = dma.hbm_to_vmem [thread:$0]  %s586_s0, 128, %s19_s21, [#allocation3], %s530_s23, %s530_s23, %s531_s24  }
  0x17   :  { %s532_s30 = smov [#allocation7]  }
  0x18   :  { %s44_s6 = sshll.u32 %s532_s30, 4  ;;  %s45_s6 = int_to_ptr.vmem [resolvable:$true] %s44_s6 }
  0x19   :  { %s490_s7 = scalar_lea.vmem %s45_s6, 1024  ;;  %p495_p11 = scmp.lt.s32.totalorder %s45_s6, %s45_s6 }
  0x1a   :  { %p491_p10 = scmp.ne.s32.totalorder %s45_s6, %s490_s7  ;;  %p496_p12 = scmp.lt.s32.totalorder %s490_s7, %s490_s7 }
  0x1c   :  { %p497_p13 = por %p496_p12, %p495_p11 }
  0x1e   :  { %p498_p0 = pnand %p497_p13, %p491_p10 }
  0x20   :  { %501 = shalt.err (!%p498_p0)
}
  0x21   :  { %50 = dma.hbm_to_vmem [thread:$0]  %s589_s3, 1024, %s45_s6, [#allocation6], %s530_s23, %s530_s23, %s531_s24  }
  0x22   :  { %522 = dma.done.wait [#allocation3], 128  }
  0x23   :  { %523 = vsyncadd [#allocation3], 4294967168 }
  0x24   :  { %524 = dma.done.wait [#allocation6], 2048  }
  0x25   :  { %525 = vsyncadd [#allocation6], 4294965248  ;;  %v533_v0 = vmov 0.0   ;;  %vm534_vm0 = vmmov 0   ;;  %v421_v1 = vld [vmem:[#allocation5 + $0x38] sm:$0xff]   ;;  %v422_v2 = vld [vmem:[#allocation5 + $0x30] sm:$0xff]  }
  0x26   :  { %371 = vmatprep.subr.bf16.mxu0 %v533_v0  ;;  %387 = vmatprep.mubr.msk.bf16.mxu0 %vm534_vm0, %v533_v0  ;;  %v423_v3 = vld [vmem:[#allocation5 + $0x28] sm:$0xff]   ;;  %v424_v4 = vld [vmem:[#allocation5 + $0x20] sm:$0xff]   ;;  %v425_v5 = vld [vmem:[#allocation5 + $0x18] sm:$0xff]   ;;  %s535_s10 = smov [#allocation8]  }
  0x27   :  { %391 = vmatprep.subr.bf16.mxu1 %v533_v0  ;;  %407 = vmatprep.mubr.msk.bf16.mxu1 %vm534_vm0, %v533_v0  ;;  %v426_v6 = vld [vmem:[#allocation5 + $0x10] sm:$0xff]   ;;  %v427_v7 = vld [vmem:[#allocation5 + $0x8] sm:$0xff]   ;;  %v428_v8 = vld [vmem:[#allocation5] sm:$0xff]   ;;  %s321_s11 = sshll.u32 %s535_s10, 4  ;;  %s322_s11 = int_to_ptr.vmem [resolvable:$true] %s321_s11 }
  0x28   :  { %372 = vmatpush3.bf16.msra.mxu0 %v421_v1  ;;  %v429_v9 = vld [vmem:[#allocation2] sm:$0xff]   ;;  %v431_v11 = vld [vmem:[#allocation7 + $0x30] sm:$0xff]   ;;  %v432_v12 = vld [vmem:[#allocation7 + $0x28] sm:$0xff]   ;;  %s502_s12 = scalar_lea.vmem %s322_s11, 256  ;;  %p507_p2 = scmp.lt.s32.totalorder %s322_s11, %s322_s11 }
  0x29   :  { %373 = vmatprep.subr.bf16.mxu0 %v533_v0  ;;  %v430_v10 = vld [vmem:[#allocation7 + $0x38] sm:$0xff]   ;;  %v433_v13 = vld [vmem:[#allocation7 + $0x20] sm:$0xff]   ;;  %v435_v15 = vld [vmem:[#allocation7 + $0x10] sm:$0xff]   ;;  %p503_p1 = scmp.ne.s32.totalorder %s322_s11, %s502_s12  ;;  %p508_p3 = scmp.lt.s32.totalorder %s502_s12, %s502_s12 }
  0x2a   :  { %392 = vmatpush3.bf16.msra.mxu1 %v430_v10  ;;  %v434_v14 = vld [vmem:[#allocation7 + $0x18] sm:$0xff]   ;;  %v436_v16 = vld [vmem:[#allocation7 + $0x8] sm:$0xff]   ;;  %v437_v17 = vld [vmem:[#allocation7] sm:$0xff]  }
  0x2b   :  { %393 = vmatprep.subr.bf16.mxu1 %v533_v0  ;;  %v334_v18 = vld [vmem:[%s588_s2] ss:$0 sm:$0xff]  ;;  %p509_p4 = por %p508_p3, %p507_p2 }
  0x2c   :  { %374 = vmatpush3.bf16.msra.mxu0 %v422_v2  ;;  %v344_v44 = vld [vmem:[%s590_s4] ss:$0 sm:$0xff] }
  0x2d   :  { %375 = vmatprep.subr.bf16.mxu0 %v533_v0  ;;  %p510_p5 = pnand %p509_p4, %p503_p1 }
  0x2e   :  { %394 = vmatpush3.bf16.msra.mxu1 %v431_v11 }
  0x2f   :  { %395 = vmatprep.subr.bf16.mxu1 %v533_v0 }
  0x30   :  { %376 = vmatpush3.bf16.msra.mxu0 %v423_v3 }
  0x31   :  { %377 = vmatprep.subr.bf16.mxu0 %v533_v0 }
  0x32   :  { %396 = vmatpush3.bf16.msra.mxu1 %v432_v12 }
  0x33   :  { %397 = vmatprep.subr.bf16.mxu1 %v533_v0 }
  0x34   :  { %378 = vmatpush3.bf16.msra.mxu0 %v424_v4 }
  0x35   :  { %379 = vmatprep.subr.bf16.mxu0 %v533_v0 }
  0x36   :  { %398 = vmatpush3.bf16.msra.mxu1 %v433_v13 }
  0x37   :  { %399 = vmatprep.subr.bf16.mxu1 %v533_v0 }
  0x38   :  { %380 = vmatpush3.bf16.msra.mxu0 %v425_v5 }
  0x39   :  { %381 = vmatprep.subr.bf16.mxu0 %v533_v0 }
  0x3a   :  { %400 = vmatpush3.bf16.msra.mxu1 %v434_v14 }
  0x3b   :  { %401 = vmatprep.subr.bf16.mxu1 %v533_v0 }
  0x3c   :  { %382 = vmatpush3.bf16.msra.mxu0 %v426_v6 }
  0x3d   :  { %383 = vmatprep.subr.bf16.mxu0 %v533_v0 }
  0x3e   :  { %402 = vmatpush3.bf16.msra.mxu1 %v435_v15 }
  0x3f   :  { %403 = vmatprep.subr.bf16.mxu1 %v533_v0 }
  0x40   :  { %384 = vmatpush3.bf16.msra.mxu0 %v427_v7 }
  0x41   :  { %385 = vmatprep.subr.bf16.mxu0 %v533_v0 }
  0x42   :  { %404 = vmatpush3.bf16.msra.mxu1 %v436_v16 }
  0x43   :  { %405 = vmatprep.subr.bf16.mxu1 %v533_v0 }
  0x44   :  { %386 = vmatpush3.bf16.msra.mxu0 %v428_v8 }
  0x46   :  { %406 = vmatpush3.bf16.msra.mxu1 %v437_v17 }
  0x47   :  { %388 = vmatmul.mubr.bf16.vlgmr.msra.gmra.mxu0 %v429_v9 }
 0x107   :  { %v176_v19 = vpop.f32.mrf.mxu0 }
 0x108   :  { %v177_v20 = vadd.f32 %v334_v18, %v176_v19 }
 0x109   :  { %v389_v21 = vpop.f32.mrf.mxu0 }
 0x10a   :  { %v183_v22 = vmul.f32 %v177_v20, %v177_v20 }
 0x10b   :  { %v179_v23 = vpop.f32.mrf.mxu0 }
 0x10c   :  { %v185_v24 = vmul.f32 %v183_v22, %v177_v20  ;;  %v180_v25 = vadd.f32 %v334_v18, %v179_v23 }
 0x10d   :  { %v390_v26 = vpop.f32.mrf.mxu0 }
 0x10e   :  { %v187_v27 = vmul.f32 0.044715, %v185_v24  ;;  %v184_v28 = vmul.f32 %v180_v25, %v180_v25 }
 0x110   :  { %v189_v29 = vadd.f32 %v187_v27, %v177_v20  ;;  %v186_v30 = vmul.f32 %v184_v28, %v180_v25 }
 0x112   :  { %v191_v31 = vmul.f32 0.7978846, %v189_v29  ;;  %v188_v32 = vmul.f32 0.044715, %v186_v30 }
 0x114   :  { %438 = vtanh.f32 %v191_v31  ;;  %v190_v33 = vadd.f32 %v188_v32, %v180_v25 }
 0x116   :  { %v192_v34 = vmul.f32 0.7978846, %v190_v33 }
 0x118   :  { %440 = vtanh.f32 %v192_v34 }
 0x121   :  { %v439_v35 = vpop.eup %438 }
 0x122   :  { %v195_v36 = vadd.f32 1.0, %v439_v35 }
 0x124   :  { %v197_v39 = vmul.f32 0.5, %v195_v36 }
 0x125   :  { %v441_v37 = vpop.eup %440 }
 0x126   :  { %v196_v38 = vadd.f32 1.0, %v441_v37  ;;  %v199_v41 = vmul.f32 %v197_v39, %v177_v20 }
 0x128   :  { %v198_v40 = vmul.f32 0.5, %v196_v38 }
 0x12a   :  { %v200_v42 = vmul.f32 %v198_v40, %v180_v25 }
 0x12c   :  { %v201_v43 = vpack.c.bf16 %v200_v42, %v199_v41 }
 0x12e   :  { %408 = vmatmul.mubr.bf16.vlgmr.msra.gmra.mxu1 %v201_v43 }
 0x1ee   :  { %v307_v45 = vpop.f32.mrf.mxu1 }
 0x1ef   :  { %v308_v46 = vadd.f32 %v344_v44, %v307_v45 }
 0x1f0   :  { %v409_v47 = vpop.f32.mrf.mxu1 }
 0x1f1   :  { %314 = vst [vmem:[#allocation8] sm:$0xff] %v308_v46 }
 0x1f2   :  { %v310_v48 = vpop.f32.mrf.mxu1 }
 0x1f3   :  { %v311_v49 = vadd.f32 %v344_v44, %v310_v48 }
 0x1f4   :  { %v410_v50 = vpop.f32.mrf.mxu1 }
 0x1f5   :  { %315 = vst [vmem:[#allocation8 + $0x8] sm:$0xff] %v311_v49 }
 0x1f6   :  { %513 = shalt.err (!%p510_p5)
}
 0x1f7   :  { %s536_s13 = smov 128   ;;  %s537_s4 = smov 8  }
 0x1f8   :  { %327 = dma.vmem_to_hbm [thread:$0]  %s322_s11, 256, %s591_s5, [#allocation4], %s536_s13, %s536_s13, %s537_s4  }
 0x1f9   :  { %526 = dma.done.wait [#allocation4], 256  }
 0x1fa   :  { %527 = vsyncadd [#allocation4], 4294967040 }
 0x1fb   :  { %331 = vsyncpa [#allocation3], 1 }
 0x1fc   :  { %332 = vsyncpa [#allocation6], 1 }
 0x1fd   :  { %333 = vsyncpa [#allocation4], 1 }

</bundles_post_ra>
